<compile_context>
chip_gen: v7x
topology: tpu7x:2x2x1
jax: 0.10.0
libtpu: 0.0.40
codegen_flags: <defaults>
</compile_context>

<pallas_src>
import jax
import jax.numpy as jnp
from jax.experimental import pallas as pl
from jax.experimental.pallas import tpu as pltpu

VALUE_RANGE = 6.0

# Lane-width candidates (widest first); all multiples of 128.
_LANE_CANDIDATES = (4096, 2048, 1024, 512, 256, 128)


def _sigmoid6_kernel(x_ref, o_ref):
    # 6*sigmoid(x) == 3*(1 + tanh(x/2)) exactly.  tanh runs on the EUP slot; the
    # remaining mul/add are cheap VPU ops -- no divide, one transcendental.
    # Exact identity, so the 1e-5 accuracy check against sigmoid(x)*6 still holds.
    x = x_ref[...].astype(jnp.float32)
    half = VALUE_RANGE * 0.5
    o_ref[...] = (half + half * jnp.tanh(0.5 * x)).astype(o_ref.dtype)


def _sublane_multiple(dtype) -> int:
    itemsize = jnp.dtype(dtype).itemsize
    if itemsize == 2:
        return 16   # bf16/fp16 pack 2 rows per sublane
    if itemsize == 1:
        return 32   # int8 / fp8
    return 8


def _device_kind() -> str:
    try:
        return jax.devices()[0].device_kind.lower()
    except Exception:
        return ""


def _num_tensorcores(kind: str) -> int:
    # v7x exposes 2 TensorCores per chip; earlier inference chips have 1.
    return 2 if "v7" in kind else 1


def _target_tile_bytes(kind: str) -> int:
    # v6e/v7x: 32 MiB scoped-VMEM default -> 4 MiB tiles (in+out, double-buffered
    # = 16 MiB).  v5e (16 MiB default) and unknown chips stay at 2 MiB (8 MiB).
    if "v6" in kind or "v7" in kind:
        return 4 << 20
    return 2 << 20


def _pick_block_rows(rows, sub, lanes, itemsize, tile_bytes, num_cores):
    """Largest sublane-aligned block <= tile_bytes; on multi-TC chips, prefer a
    block size whose grid-step count splits evenly across TensorCores."""
    target = max(sub, (tile_bytes // (lanes * itemsize)) // sub * sub)
    block = rows if rows <= target else target
    if num_cores > 1 and rows > sub and pl.cdiv(rows, block) % num_cores != 0:
        b = (min(block, rows - 1) // sub) * sub
        while b >= sub:
            if pl.cdiv(rows, b) % num_cores == 0:
                return b
            b -= sub
    return block


def _grid_semantics(num_cores: int, grid_steps: int):
    # Explicit core-parallel sharding across TensorCores (v7x) when the step
    # count divides evenly; otherwise the proven "parallel" semantics.
    if num_cores > 1 and grid_steps % num_cores == 0:
        core_parallel = getattr(pltpu, "CORE_PARALLEL", None)
        if core_parallel is not None:
            return (core_parallel,)
    return ("parallel",)


def sigmoid6(x, *, donate: bool = False):
    """Elementwise sigmoid(x) * 6 via Pallas. Accepts any shape / floating dtype."""
    orig_shape = x.shape
    dtype = x.dtype
    if not jnp.issubdtype(dtype, jnp.floating):
        raise TypeError(f"sigmoid6 expects a floating dtype, got {dtype}")
    n = x.size
    if n == 0:
        return x

    itemsize = jnp.dtype(dtype).itemsize
    sub = _sublane_multiple(dtype)
    kind = _device_kind()
    num_cores = _num_tensorcores(kind)
    tile_bytes = _target_tile_bytes(kind)

    # No-pad fast path: widest lane count that divides n exactly.
    lanes = next((c for c in _LANE_CANDIDATES if n % c == 0), None)

    if lanes is None:
        # Ragged size (not a multiple of 128): pad once up to a tile-able size.
        # TODO(synk): for large ragged inputs, avoid the extra pad+slice HBM passes
        # by running the aligned prefix through the fast path and the <128-element
        # remainder through a tiny second pallas_call.
        lanes = 128
        pad = (-n) % (sub * lanes)
        x_flat = jnp.concatenate(
            [jnp.reshape(x, (-1,)), jnp.zeros((pad,), dtype=dtype)]
        )
        padded = True
    else:
        x_flat = jnp.reshape(x, (-1,))  # metadata-only reshape, no HBM copy
        padded = False

    rows = x_flat.size // lanes
    x2d = jnp.reshape(x_flat, (rows, lanes))

    block_rows = _pick_block_rows(rows, sub, lanes, itemsize, tile_bytes, num_cores)
    grid_steps = pl.cdiv(rows, block_rows)

    out = pl.pallas_call(
        _sigmoid6_kernel,
        out_shape=jax.ShapeDtypeStruct((rows, lanes), dtype),
        grid_spec=pltpu.PrefetchScalarGridSpec(
            num_scalar_prefetch=0,
            grid=(grid_steps,),
            in_specs=[pl.BlockSpec((block_rows, lanes), lambda i: (i, 0))],
            out_specs=pl.BlockSpec((block_rows, lanes), lambda i: (i, 0)),
        ),
        compiler_params=pltpu.CompilerParams(
            dimension_semantics=_grid_semantics(num_cores, grid_steps),
        ),
        # Optional donation: aliases the (rows, lanes) input buffer to the output.
        input_output_aliases=({0: 0} if donate else {}),
    )(x2d)

    out_flat = jnp.reshape(out, (-1,))
    if padded:
        out_flat = out_flat[:n]
    return jnp.reshape(out_flat, orig_shape)


if __name__ == "__main__":
    key = jax.random.PRNGKey(0)

    # NCHW input, same convention as the PyTorch module (fast no-pad path).
    x = jax.random.normal(key, (2, 4, 16, 16), dtype=jnp.float32)
    y = sigmoid6(x)
    jax.block_until_ready(y)
    y_ref = jax.nn.sigmoid(x) * VALUE_RANGE
    assert y.shape == x.shape and y.dtype == x.dtype
    assert jnp.allclose(y, y_ref, atol=1e-5, rtol=1e-5)

    # Ragged fallback path (size not a multiple of 128).
    x2 = jax.random.normal(jax.random.PRNGKey(1), (3, 5, 7), dtype=jnp.float32)
    y2 = sigmoid6(x2)
    jax.block_until_ready(y2)
    y2_ref = jax.nn.sigmoid(x2) * VALUE_RANGE
    assert y2.shape == x2.shape and y2.dtype == x2.dtype
    assert jnp.allclose(y2, y2_ref, atol=1e-5, rtol=1e-5)

    # Multi-block path (exercises the pipelined grid and partial/even-grid logic).
    x3 = jax.random.normal(jax.random.PRNGKey(2), (8, 16, 128, 128), dtype=jnp.float32)
    y3 = sigmoid6(x3)
    jax.block_until_ready(y3)
    y3_ref = jax.nn.sigmoid(x3) * VALUE_RANGE
    assert y3.shape == x3.shape and y3.dtype == x3.dtype
    assert jnp.allclose(y3, y3_ref, atol=1e-5, rtol=1e-5)

    print("KERNEL_OK")
</pallas_src>

<mosaic_0001>
module attributes {stable_mosaic.version = 11 : i64} {
  func.func @_sigmoid6_kernel(%arg0: i32, %arg1: memref<1x2048xf32, #tpu.memory_space<vmem>>, %arg2: memref<1x2048xf32, #tpu.memory_space<vmem>>) attributes {dimension_semantics = [#tpu.dimension_semantics<parallel>], iteration_bounds = array<i64: 1>, scalar_prefetch = 0 : i64, scratch_operands = 0 : i64, tpu.core_type = #tpu.core_type<tc>, window_params = [{transform_indices = @transform_0, window_bounds = array<i64: 1, 2048>}, {transform_indices = @transform_1, window_bounds = array<i64: 1, 2048>}]} {
    %c0 = arith.constant 0 : index
    %c0_0 = arith.constant 0 : index
    %0 = vector.load %arg1[%c0, %c0_0] : memref<1x2048xf32, #tpu.memory_space<vmem>>, vector<1x2048xf32>
    %cst = arith.constant 5.000000e-01 : f32
    %1 = vector.broadcast %cst : f32 to vector<1x2048xf32>
    %2 = arith.mulf %1, %0 : vector<1x2048xf32>
    %3 = math.tanh %2 : vector<1x2048xf32>
    %cst_1 = arith.constant 3.000000e+00 : f32
    %4 = vector.broadcast %cst_1 : f32 to vector<1x2048xf32>
    %5 = arith.mulf %4, %3 : vector<1x2048xf32>
    %cst_2 = arith.constant 3.000000e+00 : f32
    %6 = vector.broadcast %cst_2 : f32 to vector<1x2048xf32>
    %7 = arith.addf %6, %5 : vector<1x2048xf32>
    %c0_3 = arith.constant 0 : index
    %c0_4 = arith.constant 0 : index
    %8 = vector.load %arg2[%c0_3, %c0_4] : memref<1x2048xf32, #tpu.memory_space<vmem>>, vector<1x2048xf32>
    tpu.vector_store %arg2[%c0_3, %c0_4], %7 {strides = array<i32>} : memref<1x2048xf32, #tpu.memory_space<vmem>>, vector<1x2048xf32>,
    return
  }
  func.func @transform_0(%arg0: i32) -> (i32, i32) {
    %c0_i32 = arith.constant 0 : i32
    %c0_i32_0 = arith.constant 0 : i32
    return %arg0, %c0_i32 : i32, i32
  }
  func.func @transform_1(%arg0: i32) -> (i32, i32) {
    %c0_i32 = arith.constant 0 : i32
    %c0_i32_0 = arith.constant 0 : i32
    return %arg0, %c0_i32 : i32, i32
  }
}

</mosaic_0001>

<bundles_post_ra>
// kernel: tpu_custom_call.1
= control target key start
LH: loop header
LB: loop body
LE: loop exit
PB: predicated region body
PF: predicated region fallthrough
CT: control target
= control target key end

     0   :  { %6 = vsyncpa [#allocation3], 0  ;;  %s138_s0 = inlined_call_operand.hbm [shape: f32[1,2048], index: 0, kind: input, shape index: {}]   ;;  %s139_s1 = inlined_call_operand.hbm [shape: f32[1,2048], index: 1, kind: output, shape index: {}]  }
   0x1   :  { %7 = vsyncpa [#allocation4], 0  ;;  %s102_s6 = smov [#allocation2]   ;;  %s54_s10 = scalar_lea.hbm %s138_s0, 256 }
   0x2   :  { %s14_s7 = sshll.u32 %s102_s6, 4  ;;  %p55_p0 = scmp.ne.s32.totalorder %s138_s0, %s54_s10  ;;  %s15_s7 = int_to_ptr.vmem [resolvable:$true] %s14_s7 }
   0x3   :  { %p58_p1 = scmp.lt.u32.totalorder %s54_s10, %s138_s0 }
   0x5   :  { %p60_p2 = pnand %p58_p1, %p55_p0 }
   0x7   :  { %63 = shalt.err (!%p60_p2)
}
   0x8   :  { %s64_s15 = scalar_lea.vmem %s15_s7, 256  ;;  %p69_p4 = scmp.lt.s32.totalorder %s15_s7, %s15_s7 }
   0x9   :  { %p65_p3 = scmp.ne.s32.totalorder %s15_s7, %s64_s15  ;;  %p70_p5 = scmp.lt.s32.totalorder %s64_s15, %s64_s15 }
   0xb   :  { %p71_p6 = por %p70_p5, %p69_p4 }
   0xd   :  { %p72_p7 = pnand %p71_p6, %p65_p3 }
   0xf   :  { %75 = shalt.err (!%p72_p7)
}
  0x10   :  { %17 = dma.hbm_to_vmem [thread:$0]  %s138_s0, 256, %s15_s7, [#allocation3]  }
  0x11   :  { %98 = dma.done.wait [#allocation3], 256  }
  0x12   :  { %99 = vsyncadd [#allocation3], 4294967040  ;;  %v21_v0 = vld [vmem:[#allocation2] sm:$0xff]  ;;  %v22_v1 = vld [vmem:[#allocation2 + $0x8] sm:$0xff]  ;;  %s103_s18 = smov [#allocation5]  }
  0x13   :  { %v23_v2 = vmul.f32 0.5, %v21_v0  ;;  %v24_v3 = vmul.f32 0.5, %v22_v1  ;;  %s39_s19 = sshll.u32 %s103_s18, 4  ;;  %s40_s19 = int_to_ptr.vmem [resolvable:$true] %s39_s19 }
  0x14   :  { %s76_s0 = scalar_lea.vmem %s40_s19, 256  ;;  %p81_p9 = scmp.lt.s32.totalorder %s40_s19, %s40_s19 }
  0x15   :  { %50 = vtanh.f32 %v23_v2  ;;  %p77_p8 = scmp.ne.s32.totalorder %s40_s19, %s76_s0  ;;  %p82_p10 = scmp.lt.s32.totalorder %s76_s0, %s76_s0 }
  0x16   :  { %52 = vtanh.f32 %v24_v3 }
  0x17   :  { %p83_p11 = por %p82_p10, %p81_p9 }
  0x19   :  { %p84_p12 = pnand %p83_p11, %p77_p8 }
  0x1f   :  { %v51_v4 = vpop.eup %50 }
  0x20   :  { %v53_v5 = vpop.eup %52  ;;  %v27_v6 = vmul.f32 3.0, %v51_v4 }
  0x21   :  { %v28_v7 = vmul.f32 3.0, %v53_v5 }
  0x22   :  { %v29_v8 = vadd.f32 3.0, %v27_v6 }
  0x23   :  { %v30_v9 = vadd.f32 3.0, %v28_v7 }
  0x24   :  { %31 = vst [vmem:[#allocation5] sm:$0xff] %v29_v8 }
  0x25   :  { %32 = vst [vmem:[#allocation5 + $0x8] sm:$0xff] %v30_v9 }
  0x26   :  { %87 = shalt.err (!%p84_p12)
}
  0x27   :  { %s88_s22 = scalar_lea.hbm %s139_s1, 256 }
  0x28   :  { %p89_p13 = scmp.ne.s32.totalorder %s139_s1, %s88_s22  ;;  %p92_p0 = scmp.lt.u32.totalorder %s88_s22, %s139_s1 }
  0x2a   :  { %p94_p1 = pnand %p92_p0, %p89_p13 }
  0x2c   :  { %97 = shalt.err (!%p94_p1)
}
  0x2d   :  { %42 = dma.vmem_to_hbm [thread:$0]  %s40_s19, 256, %s139_s1, [#allocation4]  }
  0x2e   :  { %100 = dma.done.wait [#allocation4], 256  }
  0x2f   :  { %101 = vsyncadd [#allocation4], 4294967040 }
  0x30   :  { %46 = vsyncpa [#allocation3], 1 }
  0x31   :  { %47 = vsyncpa [#allocation4], 1 }

</bundles_post_ra>
